<compile_context>
chip_gen: v7x
topology: tpu7x:2x2x1
jax: 0.10.0
libtpu: 0.0.40
codegen_flags: <defaults>
</compile_context>

<pallas_src>
import functools

import jax
import jax.numpy as jnp
from jax import lax
from jax.experimental import pallas as pl
from jax.experimental.pallas import tpu as pltpu


def _conv_stats_kernel(x_ref, w_ref, b_ref, y_ref, stat_ref, *, NB, H, KH):
    """Phase 1: 3x3 conv + bias for NB whole images + per-lane BN partials.

    x_ref:    (NB, H+KH-1, row_pad)   bf16, zero-padded rows, lanes = w*Cin+ci
    w_ref:    (KH, row_pad, W*Cout)   bf16 block-banded conv weights
    b_ref:    (1, W*Cout)             f32 conv bias broadcast over w
    y_ref:    (NB*H, W*Cout)          bf16 conv+bias output (lane-dense)
    stat_ref: (1, 2, W*Cout)          f32 row 0: per-lane sum, row 1: sum of sq
    """
    M = NB * H
    k_lanes = x_ref.shape[-1]
    out_lanes = w_ref.shape[-1]

    acc = jnp.zeros((M, out_lanes), jnp.float32)
    # One accumulated MXU dot per kh row tap; kw taps live in the banded W.
    for kh in range(KH):
        slab = x_ref[:, kh:kh + H, :].reshape(M, k_lanes)      # bf16 (M, K)
        acc = acc + jnp.dot(slab, w_ref[kh],
                            preferred_element_type=jnp.float32)

    y = acc + b_ref[...]                                       # f32 (M, lanes)
    y_ref[...] = y.astype(y_ref.dtype)                         # bf16 writeback

    # Single-pass BN partials, one 2-row store (no masked 1-sublane stores).
    stat_ref[0] = jnp.concatenate(
        [jnp.sum(y, axis=0, keepdims=True),
         jnp.sum(y * y, axis=0, keepdims=True)], axis=0)


def _bn_relu_kernel(y_ref, scale_ref, shift_ref, o_ref):
    """Phase 2: y*scale + shift (folded BN) + ReLU on a large lane-dense block."""
    y = y_ref[...].astype(jnp.float32)
    o_ref[...] = jnp.maximum(y * scale_ref[...] + shift_ref[...], 0.0)


def _build_banded_weight(w_hwio, W, row_pad):
    """Pack (KH,KW,Cin,Cout) weights into (KH, row_pad, W*Cout) banded blocks.

    Row index (within a kh block): w_pad*Cin + ci, w_pad in [0, W+KW-1).
    Col index:                      w*Cout + co.
    Entry = w_hwio[kh, w_pad - w, ci, co] when 0 <= w_pad - w < KW, else 0.
    """
    KH, KW, Cin, Cout = w_hwio.shape
    Wp = W + KW - 1
    wp = jnp.arange(W)
    blocks = []
    for kh in range(KH):
        a = jnp.zeros((Wp, Cin, W, Cout), jnp.float32)
        for kw in range(KW):
            a = a.at[wp + kw, :, wp, :].set(
                jnp.broadcast_to(w_hwio[kh, kw], (W, Cin, Cout)))
        a = a.reshape(Wp * Cin, W * Cout)
        a = jnp.pad(a, ((0, row_pad - Wp * Cin), (0, 0)))
        blocks.append(a)
    return jnp.stack(blocks, axis=0)                    # (KH, row_pad, W*Cout)


def _images_per_step(N, H, target_rows):
    """Largest divisor NB of N with NB*H roughly <= target_rows (>= 1)."""
    nb = max(1, min(N, target_rows // max(H, 1)))
    while N % nb:
        nb -= 1
    return nb


def conv_block(x_nchw, weight_oihw, bias, gamma, beta, *, eps=1e-5):
    """x_nchw: (N, Cin, H, W) float32. Returns (N, Cout, H, W) float32."""
    N, Cin, H, W = x_nchw.shape
    Cout, Cin2, KH, KW = weight_oihw.shape
    assert Cin2 == Cin and KH == 3 and KW == 3, "specialized for 3x3, s=1, p=1"
    pad = 1

    out_lanes = W * Cout                          # 16*8 = 128 -> lane-dense
    row_lanes = (W + KW - 1) * Cin                # 18*4 = 72
    row_pad = ((row_lanes + 127) // 128) * 128    # pad row lanes to 128

    # Images per grid step: target ~256 M-rows per dot (phase 1) and ~1024
    # rows per HBM block (phase 2). Per-step x slab stays small (VMEM safe).
    NB = _images_per_step(N, H, 256)
    n_blk = N // NB
    NB2 = _images_per_step(N, H, 1024)
    tile_m2 = NB2 * H
    n_blk2 = (N * H) // tile_m2

    # ---- wrapper-side packing (weights once; activation reshapes are cheap) ----
    x_nhwc = jnp.transpose(x_nchw, (0, 2, 3, 1)).astype(jnp.float32)
    x_padded = jnp.pad(x_nhwc, ((0, 0), (pad, pad), (pad, pad), (0, 0)))
    x_rows = x_padded.reshape(N, H + KH - 1, row_lanes)
    x_rows = jnp.pad(x_rows, ((0, 0), (0, 0), (0, row_pad - row_lanes)))
    x_rows = x_rows.astype(jnp.bfloat16)                  # bf16 MXU operand

    w_hwio = jnp.transpose(weight_oihw, (2, 3, 1, 0)).astype(jnp.float32)
    bigw = _build_banded_weight(w_hwio, W, row_pad).astype(jnp.bfloat16)
    bias_l = jnp.tile(bias.astype(jnp.float32), (W,)).reshape(1, out_lanes)

    conv_kernel = functools.partial(_conv_stats_kernel, NB=NB, H=H, KH=KH)

    # ---- phase 1: conv + bias + per-lane stat partials ----
    y_flat, stats = pl.pallas_call(
        conv_kernel,
        grid=(n_blk,),
        in_specs=[
            pl.BlockSpec((NB, H + KH - 1, row_pad), lambda i: (i, 0, 0)),
            pl.BlockSpec((KH, row_pad, out_lanes), lambda i: (0, 0, 0)),
            pl.BlockSpec((1, out_lanes), lambda i: (0, 0)),
        ],
        out_specs=(
            pl.BlockSpec((NB * H, out_lanes), lambda i: (i, 0)),
            pl.BlockSpec((1, 2, out_lanes), lambda i: (i, 0, 0)),
        ),
        out_shape=(
            jax.ShapeDtypeStruct((N * H, out_lanes), jnp.bfloat16),
            jax.ShapeDtypeStruct((n_blk, 2, out_lanes), jnp.float32),
        ),
        compiler_params=pltpu.CompilerParams(
            dimension_semantics=("parallel",)),
    )(x_rows, bigw, bias_l)

    # ---- tiny O(Cout) reduction + BN folding, done in XLA ----
    m = jnp.float32(N * H * W)
    lane_stats = jnp.sum(stats, axis=0)                      # (2, W*Cout)
    ch_stats = lane_stats.reshape(2, W, Cout).sum(axis=1)    # (2, Cout)
    mean = ch_stats[0] / m
    var = jnp.maximum(ch_stats[1] / m - mean * mean, 0.0)    # biased variance
    rstd = lax.rsqrt(var + eps)
    scale = gamma.astype(jnp.float32) * rstd
    shift = beta.astype(jnp.float32) - mean * scale
    scale_l = jnp.tile(scale, (W,)).reshape(1, out_lanes)
    shift_l = jnp.tile(shift, (W,)).reshape(1, out_lanes)

    # ---- phase 2: normalize + ReLU on large lane-dense blocks ----
    out_flat = pl.pallas_call(
        _bn_relu_kernel,
        grid=(n_blk2,),
        in_specs=[
            pl.BlockSpec((tile_m2, out_lanes), lambda i: (i, 0)),
            pl.BlockSpec((1, out_lanes), lambda i: (0, 0)),
            pl.BlockSpec((1, out_lanes), lambda i: (0, 0)),
        ],
        out_specs=pl.BlockSpec((tile_m2, out_lanes), lambda i: (i, 0)),
        out_shape=jax.ShapeDtypeStruct((N * H, out_lanes), jnp.float32),
        compiler_params=pltpu.CompilerParams(
            dimension_semantics=("parallel",)),
    )(y_flat, scale_l, shift_l)

    out_nhwc = out_flat.reshape(N, H, W, Cout)
    return jnp.transpose(out_nhwc, (0, 3, 1, 2))


def _reference(x_nchw, weight_oihw, bias, gamma, beta, eps=1e-5):
    """Pure-JAX reference matching PyTorch training-mode forward."""
    y = lax.conv_general_dilated(
        x_nchw, weight_oihw, window_strides=(1, 1), padding=((1, 1), (1, 1)),
        dimension_numbers=("NCHW", "OIHW", "NCHW"))
    y = y + bias.reshape(1, -1, 1, 1)
    mean = jnp.mean(y, axis=(0, 2, 3), keepdims=True)
    var = jnp.mean((y - mean) ** 2, axis=(0, 2, 3), keepdims=True)
    y = (y - mean) * lax.rsqrt(var + eps)
    y = y * gamma.reshape(1, -1, 1, 1) + beta.reshape(1, -1, 1, 1)
    return jnp.maximum(y, 0.0)


if __name__ == "__main__":
    N, Cin, H, W = 2, 4, 16, 16
    Cout, KH, KW = 8, 3, 3

    key = jax.random.PRNGKey(0)
    kx, kw_, kb = jax.random.split(key, 3)

    x = jax.random.normal(kx, (N, Cin, H, W), dtype=jnp.float32)

    # Deterministic parameter init (PyTorch-style uniform for conv, BN defaults).
    fan_in = Cin * KH * KW
    bound = 1.0 / (fan_in ** 0.5)
    weight = jax.random.uniform(kw_, (Cout, Cin, KH, KW), jnp.float32,
                                minval=-bound, maxval=bound)
    bias = jax.random.uniform(kb, (Cout,), jnp.float32,
                              minval=-bound, maxval=bound)
    gamma = jnp.ones((Cout,), jnp.float32)   # BatchNorm2d default weight
    beta = jnp.zeros((Cout,), jnp.float32)   # BatchNorm2d default bias

    out = jax.block_until_ready(conv_block(x, weight, bias, gamma, beta))

    ref = _reference(x, weight, bias, gamma, beta)
    assert out.shape == (N, Cout, H, W)
    # bf16 matmul operands + bf16 conv intermediate -> looser tolerance than
    # the f32-only path (accumulation and BN stats remain f32).
    assert jnp.allclose(out, ref, atol=5e-2, rtol=5e-2), "mismatch vs reference"

    print("KERNEL_OK")
</pallas_src>

<mosaic_0001>
module attributes {stable_mosaic.version = 11 : i64} {
  func.func @_conv_stats_kernel(%arg0: i32, %arg1: memref<2x18x128xbf16, #tpu.memory_space<vmem>>, %arg2: memref<3x128x128xbf16, #tpu.memory_space<vmem>>, %arg3: memref<1x128xf32, #tpu.memory_space<vmem>>, %arg4: memref<32x128xbf16, #tpu.memory_space<vmem>>, %arg5: memref<1x2x128xf32, #tpu.memory_space<vmem>>) attributes {dimension_semantics = [#tpu.dimension_semantics<parallel>], iteration_bounds = array<i64: 1>, scalar_prefetch = 0 : i64, scratch_operands = 0 : i64, tpu.core_type = #tpu.core_type<tc>, window_params = [{transform_indices = @transform_0, window_bounds = array<i64: 2, 18, 128>}, {pipeline_mode = #tpu.pipeline_mode<synchronous>, transform_indices = @transform_1, window_bounds = array<i64: 3, 128, 128>}, {pipeline_mode = #tpu.pipeline_mode<synchronous>, transform_indices = @transform_2, window_bounds = array<i64: 1, 128>}, {transform_indices = @transform_3, window_bounds = array<i64: 32, 128>}, {transform_indices = @transform_4, window_bounds = array<i64: 1, 2, 128>}]} {
    %cst = arith.constant 0.000000e+00 : f32
    %0 = vector.broadcast %cst : f32 to vector<32x128xf32>
    %c0 = arith.constant 0 : index
    %c0_0 = arith.constant 0 : index
    %c0_1 = arith.constant 0 : index
    %1 = vector.load %arg1[%c0, %c0_0, %c0_1] : memref<2x18x128xbf16, #tpu.memory_space<vmem>>, vector<2x16x128xbf16>
    %2 = vector.shape_cast %1 : vector<2x16x128xbf16> to vector<32x128xbf16>
    %c0_2 = arith.constant 0 : index
    %c0_3 = arith.constant 0 : index
    %c0_4 = arith.constant 0 : index
    %3 = vector.load %arg2[%c0_2, %c0_3, %c0_4] : memref<3x128x128xbf16, #tpu.memory_space<vmem>>, vector<1x128x128xbf16>
    %4 = vector.shape_cast %3 : vector<1x128x128xbf16> to vector<128x128xbf16>
    %cst_5 = arith.constant dense<0.000000e+00> : vector<32x128xf32>
    %5 = tpu.matmul %2, %4, %cst_5 {dimension_numbers = #tpu.dot_dimension_numbers<[1], [0], [0], [1], [0, 0, 1, 1], [], []>} : vector<32x128xbf16>, vector<128x128xbf16>, vector<32x128xf32> -> vector<32x128xf32>
    %6 = arith.addf %0, %5 : vector<32x128xf32>
    %c0_6 = arith.constant 0 : index
    %c1 = arith.constant 1 : index
    %c0_7 = arith.constant 0 : index
    %7 = vector.load %arg1[%c0_6, %c1, %c0_7] : memref<2x18x128xbf16, #tpu.memory_space<vmem>>, vector<2x16x128xbf16>
    %8 = vector.shape_cast %7 : vector<2x16x128xbf16> to vector<32x128xbf16>
    %c1_8 = arith.constant 1 : index
    %c0_9 = arith.constant 0 : index
    %c0_10 = arith.constant 0 : index
    %9 = vector.load %arg2[%c1_8, %c0_9, %c0_10] : memref<3x128x128xbf16, #tpu.memory_space<vmem>>, vector<1x128x128xbf16>
    %10 = vector.shape_cast %9 : vector<1x128x128xbf16> to vector<128x128xbf16>
    %cst_11 = arith.constant dense<0.000000e+00> : vector<32x128xf32>
    %11 = tpu.matmul %8, %10, %cst_11 {dimension_numbers = #tpu.dot_dimension_numbers<[1], [0], [0], [1], [0, 0, 1, 1], [], []>} : vector<32x128xbf16>, vector<128x128xbf16>, vector<32x128xf32> -> vector<32x128xf32>
    %12 = arith.addf %6, %11 : vector<32x128xf32>
    %c0_12 = arith.constant 0 : index
    %c2 = arith.constant 2 : index
    %c0_13 = arith.constant 0 : index
    %13 = vector.load %arg1[%c0_12, %c2, %c0_13] : memref<2x18x128xbf16, #tpu.memory_space<vmem>>, vector<2x16x128xbf16>
    %14 = vector.shape_cast %13 : vector<2x16x128xbf16> to vector<32x128xbf16>
    %c2_14 = arith.constant 2 : index
    %c0_15 = arith.constant 0 : index
    %c0_16 = arith.constant 0 : index
    %15 = vector.load %arg2[%c2_14, %c0_15, %c0_16] : memref<3x128x128xbf16, #tpu.memory_space<vmem>>, vector<1x128x128xbf16>
    %16 = vector.shape_cast %15 : vector<1x128x128xbf16> to vector<128x128xbf16>
    %cst_17 = arith.constant dense<0.000000e+00> : vector<32x128xf32>
    %17 = tpu.matmul %14, %16, %cst_17 {dimension_numbers = #tpu.dot_dimension_numbers<[1], [0], [0], [1], [0, 0, 1, 1], [], []>} : vector<32x128xbf16>, vector<128x128xbf16>, vector<32x128xf32> -> vector<32x128xf32>
    %18 = arith.addf %12, %17 : vector<32x128xf32>
    %c0_18 = arith.constant 0 : index
    %c0_19 = arith.constant 0 : index
    %19 = vector.load %arg3[%c0_18, %c0_19] : memref<1x128xf32, #tpu.memory_space<vmem>>, vector<1x128xf32>
    %20 = vector.broadcast %19 : vector<1x128xf32> to vector<32x128xf32>
    %21 = arith.addf %18, %20 : vector<32x128xf32>
    %22 = arith.truncf %21 : vector<32x128xf32> to vector<32x128xbf16>
    %c0_20 = arith.constant 0 : index
    %c0_21 = arith.constant 0 : index
    %23 = vector.load %arg4[%c0_20, %c0_21] : memref<32x128xbf16, #tpu.memory_space<vmem>>, vector<32x128xbf16>
    tpu.vector_store %arg4[%c0_20, %c0_21], %22 {strides = array<i32>} : memref<32x128xbf16, #tpu.memory_space<vmem>>, vector<32x128xbf16>,
    %cst_22 = arith.constant dense<0.000000e+00> : vector<128xf32>
    %24 = vector.multi_reduction <add>, %21, %cst_22 [0] : vector<32x128xf32> to vector<128xf32>
    %25 = vector.shape_cast %24 : vector<128xf32> to vector<1x128xf32>
    %26 = arith.mulf %21, %21 : vector<32x128xf32>
    %cst_23 = arith.constant dense<0.000000e+00> : vector<128xf32>
    %27 = vector.multi_reduction <add>, %26, %cst_23 [0] : vector<32x128xf32> to vector<128xf32>
    %28 = vector.shape_cast %27 : vector<128xf32> to vector<1x128xf32>
    %29 = tpu.concatenate %25, %28 in 0 : vector<1x128xf32>, vector<1x128xf32> -> vector<2x128xf32>
    %c0_24 = arith.constant 0 : index
    %c0_25 = arith.constant 0 : index
    %c0_26 = arith.constant 0 : index
    %30 = vector.load %arg5[%c0_24, %c0_25, %c0_26] : memref<1x2x128xf32, #tpu.memory_space<vmem>>, vector<1x2x128xf32>
    %31 = vector.shape_cast %30 : vector<1x2x128xf32> to vector<2x128xf32>
    %32 = vector.shape_cast %29 : vector<2x128xf32> to vector<1x2x128xf32>
    tpu.vector_store %arg5[%c0_24, %c0_25, %c0_26], %32 {strides = array<i32>} : memref<1x2x128xf32, #tpu.memory_space<vmem>>, vector<1x2x128xf32>,
    return
  }
  func.func @transform_0(%arg0: i32) -> (i32, i32, i32) {
    %c0_i32 = arith.constant 0 : i32
    %c0_i32_0 = arith.constant 0 : i32
    %c0_i32_1 = arith.constant 0 : i32
    return %arg0, %c0_i32, %c0_i32_0 : i32, i32, i32
  }
  func.func @transform_1(%arg0: i32) -> (i32, i32, i32) {
    %c0_i32 = arith.constant 0 : i32
    %c0_i32_0 = arith.constant 0 : i32
    %c0_i32_1 = arith.constant 0 : i32
    %c0_i32_2 = arith.constant 0 : i32
    return %c0_i32, %c0_i32_0, %c0_i32_1 : i32, i32, i32
  }
  func.func @transform_2(%arg0: i32) -> (i32, i32) {
    %c0_i32 = arith.constant 0 : i32
    %c0_i32_0 = arith.constant 0 : i32
    %c0_i32_1 = arith.constant 0 : i32
    return %c0_i32, %c0_i32_0 : i32, i32
  }
  func.func @transform_3(%arg0: i32) -> (i32, i32) {
    %c0_i32 = arith.constant 0 : i32
    %c0_i32_0 = arith.constant 0 : i32
    return %arg0, %c0_i32 : i32, i32
  }
  func.func @transform_4(%arg0: i32) -> (i32, i32, i32) {
    %c0_i32 = arith.constant 0 : i32
    %c0_i32_0 = arith.constant 0 : i32
    %c0_i32_1 = arith.constant 0 : i32
    return %arg0, %c0_i32, %c0_i32_0 : i32, i32, i32
  }
}

</mosaic_0001>

<bundles_post_ra>
// kernel: tpu_custom_call.1
= control target key start
LH: loop header
LB: loop body
LE: loop exit
PB: predicated region body
PF: predicated region fallthrough
CT: control target
= control target key end

     0   :  { %10 = vsyncpa [#allocation3], 0  ;;  %s974_s0 = inlined_call_operand.vmem [shape: bf16[2,18,128], index: 0, kind: input, shape index: {}]   ;;  %s975_s1 = inlined_call_operand.hbm [shape: bf16[3,128,128], index: 1, kind: input, shape index: {}]   ;;  %s976_s2 = inlined_call_operand.vmem [shape: f32[1,128], index: 2, kind: input, shape index: {}]   ;;  %s977_s3 = inlined_call_operand.hbm [shape: bf16[32,128], index: 3, kind: output, shape index: {0}]   ;;  %s978_s4 = inlined_call_operand.hbm [shape: f32[1,2,128], index: 4, kind: output, shape index: {1}]  }
   0x1   :  { %11 = vsyncpa [#allocation4], 0 }
   0x2   :  { %12 = vsyncpa [#allocation7], 0  ;;  %s826_s15 = smov [#allocation2]   ;;  %s754_s19 = scalar_lea.hbm %s975_s1, 3072 }
   0x3   :  { %s20_s16 = sshll.u32 %s826_s15, 4  ;;  %p755_p0 = scmp.ne.s32.totalorder %s975_s1, %s754_s19  ;;  %s21_s16 = int_to_ptr.vmem [resolvable:$true] %s20_s16 }
   0x4   :  { %p758_p1 = scmp.lt.u32.totalorder %s754_s19, %s975_s1 }
   0x6   :  { %p760_p2 = pnand %p758_p1, %p755_p0 }
   0x8   :  { %763 = shalt.err (!%p760_p2)
}
   0x9   :  { %s764_s24 = scalar_lea.vmem %s21_s16, 3072  ;;  %p769_p4 = scmp.lt.s32.totalorder %s21_s16, %s21_s16 }
   0xa   :  { %p765_p3 = scmp.ne.s32.totalorder %s21_s16, %s764_s24  ;;  %p770_p5 = scmp.lt.s32.totalorder %s764_s24, %s764_s24 }
   0xc   :  { %p771_p6 = por %p770_p5, %p769_p4 }
   0xe   :  { %p772_p7 = pnand %p771_p6, %p765_p3 }
  0x10   :  { %775 = shalt.err (!%p772_p7)
}
  0x11   :  { %s827_s25 = smov 64   ;;  %s828_s26 = smov 4  }
  0x12   :  { %26 = dma.hbm_to_vmem [thread:$0]  %s975_s1, 3072, %s21_s16, [#allocation3], %s827_s25, %s827_s25, %s828_s26  }
  0x13   :  { %820 = dma.done.wait [#allocation3], 3072  }
  0x14   :  { %821 = vsyncadd [#allocation3], 4294964224  ;;  %v728_v0 = vld [vmem:[#allocation2] sm:$0xff]   ;;  %v729_v1 = vld [vmem:[#allocation2 + $0x8] sm:$0xff]   ;;  %vm55_vm0 = vsmask.f32 3328 }
  0x15   :  { %675 = vmatprep.subr.bf16.mxu0 %v728_v0  ;;  %v730_v2 = vld [vmem:[#allocation2 + $0x10] sm:$0xff]   ;;  %v731_v3 = vld [vmem:[#allocation2 + $0x18] sm:$0xff]   ;;  %v736_v4 = vld [vmem:[#allocation2 + $0x40] sm:$0xff]   ;;  %vm56_vm1 = vsmask.f32 7440  ;;  %vm343_vm2 = vcmask 1042432  }
  0x16   :  { %676 = vmatpush3.bf16.msra.mxu0 %v728_v0  ;;  %v33_v5 = vld [vmem:[%s974_s0] sm:$0xf]  ;;  %v877_v6 = vld [vmem:[%s974_s0 + $0x4] sm:$0xf]  ;;  %655 = vmatprep.subr.bf16.mxu1 %v736_v4  ;;  %v732_v11 = vld [vmem:[#allocation2 + $0x20] sm:$0xff]   ;;  %vm344_vm3 = vcmask 1046532  }
  0x17   :  { %677 = vmatprep.subr.bf16.mxu0 %v729_v1  ;;  %v59_v7 = vshrl.u32 %v33_v5, 16  ;;  %v62_v8 = vshll.u32 %v33_v5, 16  ;;  %v583_v9 = vcombine.low %v33_v5, %v877_v6  ;;  %656 = vmatpush3.bf16.msra.mxu1 %v736_v4  ;;  %v739_v10 = vld [vmem:[#allocation2 + $0x48] sm:$0xff]   ;;  %v72_v13 = vshrl.u32 %v877_v6, 16  ;;  %v742_v15 = vld [vmem:[#allocation2 + $0x50] sm:$0xff]   ;;  %v744_v20 = vld [vmem:[#allocation2 + $0x58] sm:$0xff]  }
  0x18   :  { %657 = vmatprep.subr.bf16.mxu1 %v739_v10  ;;  %v884_v16 = vld [vmem:[%s974_s0 + $0xc] sm:$0xf]  ;;  %v733_v17 = vld [vmem:[#allocation2 + $0x28] sm:$0xff]   ;;  %v889_v18 = vld [vmem:[%s974_s0 + $0x10] sm:$0xf]  ;;  %v68_v21 = vshll.u32 %v877_v6, 16 }
  0x19   :  { %691 = vmatprep.mubr.bf16.mxu0 %v583_v9  ;;  %v61_v12 = vrot.slane %v59_v7, 4  ;;  %v64_v14 = vrot.slane %v62_v8, 5  ;;  %v83_v19 = vshrl.u32 %v884_v16, 16  ;;  %v734_v22 = vld [vmem:[#allocation2 + $0x30] sm:$0xff]   ;;  %v86_v23 = vshll.u32 %v884_v16, 16  ;;  %v746_v28 = vld [vmem:[#allocation2 + $0x60] sm:$0xff]   ;;  %vm902_vm4 = vmor %vm55_vm0, %vm56_vm1 }
  0x1a   :  { %678 = vmatpush3.bf16.msra.mxu0 %v729_v1  ;;  %v74_v24 = vrot.slane %v72_v13, 4  ;;  %v96_v25 = vshrl.u32 %v889_v18, 16  ;;  %v70_v27 = vrot.slane %v68_v21, 5  ;;  %v348_v29 = vrot.slane %v877_v6, 5  ;;  %v735_v32 = vld [vmem:[#allocation2 + $0x38] sm:$0xff]   ;;  %v748_v37 = vld [vmem:[#allocation2 + $0x68] sm:$0xff]   ;;  %vm916_vm5 = vmor %vm343_vm2, %vm344_vm3 }
  0x1b   :  { %679 = vmatprep.subr.bf16.mxu0 %v730_v2  ;;  %658 = vmatpush3.bf16.msra.mxu1 %v739_v10  ;;  %v65_v26 = vor.u32 %v64_v14, %v61_v12  ;;  %v92_v31 = vshll.u32 %v889_v18, 16  ;;  %v85_v33 = vrot.slane %v83_v19, 4  ;;  %v88_v34 = vrot.slane %v86_v23, 5  ;;  %v53_v39 = vld [vmem:[%s974_s0 + $0x8] sm:$0x1]  ;;  %v738_v50 = vld [vmem:[#allocation2 + $0x80] sm:$0xff]  }
  0x1c   :  { %659 = vmatprep.subr.bf16.mxu1 %v742_v15  ;;  %v75_v30 = vor.u32 %v74_v24, %v70_v27  ;;  %v98_v36 = vrot.slane %v96_v25, 4  ;;  %v350_v42 = vrot.slane %v348_v29, 4  ;;  %v78_v43 = vshll.u32 %v53_v39, 16  ;;  %v909_v46 = vld [vmem:[%s974_s0 + $0x14] sm:$0x1]  ;;  %v750_v51 = vld [vmem:[#allocation2 + $0x70] sm:$0xff]  }
  0x1d   :  { %v66_v35 = vrot.slane %v65_v26, 4  ;;  %v94_v38 = vrot.slane %v92_v31, 5  ;;  %v351_v44 = vrot.slane %v53_v39, 5  ;;  %v89_v45 = vor.u32 %v88_v34, %v85_v33  ;;  %v337_v48 = vld [vmem:[%s974_s0] sm:$0xe]  ;;  %v752_v1 = vld [vmem:[#allocation2 + $0x78] sm:$0xff]  }
  0x1e   :  { %680 = vmatpush3.bf16.msra.mxu0 %v730_v2  ;;  %v76_v41 = vrot.slane %v75_v30, 4  ;;  %v80_v53 = vrot.slane %v78_v43, 5  ;;  %v102_v54 = vshll.u32 %v909_v46, 16  ;;  %v593_v55 = vrot.slane %v337_v48, 9  ;;  %v741_v0 = vld [vmem:[#allocation2 + $0x88] sm:$0xff]   ;;  %v743_v5 = vld [vmem:[#allocation2 + $0x90] sm:$0xff]  }
  0x1f   :  { %681 = vmatprep.subr.bf16.mxu0 %v731_v3  ;;  %660 = vmatpush3.bf16.msra.mxu1 %v742_v15  ;;  %v99_v47 = vor.u32 %v98_v36, %v94_v38  ;;  %v71_v52 = vsel %vm902_vm4, %v66_v35, %v70_v27  ;;  %v584_v56 = vcombine.low %v884_v16, %v889_v18  ;;  %v90_v58 = vrot.slane %v89_v45, 4  ;;  %v745_v7 = vld [vmem:[#allocation2 + $0x98] sm:$0xff]   ;;  %v747_v8 = vld [vmem:[#allocation2 + $0xa0] sm:$0xff]   ;;  %v749_v9 = vld [vmem:[#allocation2 + $0xa8] sm:$0xff]   ;;  %s829_s19 = smov [#allocation5]  }
  0x20   :  { %661 = vmatprep.subr.bf16.mxu1 %v744_v20  ;;  %v81_v57 = vsel %vm902_vm4, %v76_v41, %v80_v53  ;;  %v352_v59 = vsel %vm916_vm5, %v350_v42, %v351_v44  ;;  %v104_v62 = vrot.slane %v102_v54, 5  ;;  %v349_v63 = vsel %vm916_vm5, %v593_v55, %v348_v29  ;;  %v338_v12 = vld [vmem:[%s974_s0 + $0xc] sm:$0xe]  ;;  %v753_v16 = vld [vmem:[#allocation2 + $0xb8] sm:$0xff]   ;;  %v605_v26 = vld [vmem:[%s976_s2] ss:$0 sm:$0xff] }
  0x21   :  { %v573_v60 = vcombine.low %v71_v52, %v81_v57  ;;  %v100_v61 = vrot.slane %v99_v47, 4  ;;  %v595_v2 = vcombine.low %v349_v63, %v352_v59  ;;  %v355_v10 = vrot.slane %v889_v18, 5  ;;  %s547_s20 = sshll.u32 %s829_s19, 4  ;;  %s548_s20 = int_to_ptr.vmem [resolvable:$true] %s547_s20 }
  0x22   :  { %682 = vmatpush3.bf16.msra.mxu0 %v731_v3  ;;  %v95_v3 = vsel %vm902_vm4, %v90_v58, %v94_v38  ;;  %v358_v13 = vrot.slane %v909_v46, 5  ;;  %v594_v14 = vrot.slane %v338_v12, 9  ;;  %s776_s2 = scalar_lea.vmem %s548_s20, 256  ;;  %p781_p9 = scmp.lt.s32.totalorder %s548_s20, %s548_s20 }
  0x23   :  { %683 = vmatprep.subr.bf16.mxu0 %v732_v11  ;;  %662 = vmatpush3.bf16.msra.mxu1 %v744_v20  ;;  %v105_v4 = vsel %vm902_vm4, %v100_v61, %v104_v62  ;;  %v357_v15 = vrot.slane %v355_v10, 4  ;;  %p777_p8 = scmp.ne.s32.totalorder %s548_s20, %s776_s2  ;;  %p782_p10 = scmp.lt.s32.totalorder %s776_s2, %s776_s2 }
  0x24   :  { %663 = vmatprep.subr.bf16.mxu1 %v746_v28  ;;  %671 = vmatprep.mubr.bf16.mxu1 %v573_v60  ;;  %v574_v6 = vcombine.low %v95_v3, %v105_v4 }
  0x25   :  { %v359_v18 = vsel %vm916_vm5, %v357_v15, %v358_v13  ;;  %p783_p11 = por %p782_p10, %p781_p9 }
  0x26   :  { %684 = vmatpush3.bf16.msra.mxu0 %v732_v11  ;;  %v751_v11 = vld [vmem:[#allocation2 + $0xb0] sm:$0xff]  }
  0x27   :  { %685 = vmatprep.subr.bf16.mxu0 %v733_v17  ;;  %664 = vmatpush3.bf16.msra.mxu1 %v746_v28  ;;  %p784_p12 = pnand %p783_p11, %p777_p8 }
  0x28   :  { %665 = vmatprep.subr.bf16.mxu1 %v748_v37 }
  0x2a   :  { %686 = vmatpush3.bf16.msra.mxu0 %v733_v17  ;;  %v356_v17 = vsel %vm916_vm5, %v594_v14, %v355_v10 }
  0x2b   :  { %687 = vmatprep.subr.bf16.mxu0 %v734_v22  ;;  %666 = vmatpush3.bf16.msra.mxu1 %v748_v37  ;;  %v596_v19 = vcombine.low %v356_v17, %v359_v18 }
  0x2c   :  { %667 = vmatprep.subr.bf16.mxu1 %v750_v51 }
  0x2e   :  { %688 = vmatpush3.bf16.msra.mxu0 %v734_v22 }
  0x2f   :  { %689 = vmatprep.subr.bf16.mxu0 %v735_v32  ;;  %668 = vmatpush3.bf16.msra.mxu1 %v750_v51 }
  0x30   :  { %669 = vmatprep.subr.bf16.mxu1 %v752_v1 }
  0x32   :  { %690 = vmatpush3.bf16.msra.mxu0 %v735_v32 }
  0x33   :  { %695 = vmatprep.subr.bf16.mxu0 %v738_v50  ;;  %670 = vmatpush3.bf16.msra.mxu1 %v752_v1 }
  0x35   :  { %692 = vmatmul.mubr.bf16.vlgmr.msra.gmra.mrb[0].mxu0 %v584_v56 }
  0x36   :  { %696 = vmatpush3.bf16.msra.mxu0 %v738_v50  ;;  %711 = vmatprep.mubr.bf16.mxu0 %v595_v2 }
  0x37   :  { %697 = vmatprep.subr.bf16.mxu0 %v741_v0  ;;  %672 = vmatmul.mubr.bf16.vlgmr.msra.gmra.mrb[0].mxu1 %v574_v6 }
  0x3a   :  { %698 = vmatpush3.bf16.msra.mxu0 %v741_v0 }
  0x3b   :  { %699 = vmatprep.subr.bf16.mxu0 %v743_v5 }
  0x3e   :  { %700 = vmatpush3.bf16.msra.mxu0 %v743_v5 }
  0x3f   :  { %701 = vmatprep.subr.bf16.mxu0 %v745_v7 }
  0x42   :  { %702 = vmatpush3.bf16.msra.mxu0 %v745_v7 }
  0x43   :  { %703 = vmatprep.subr.bf16.mxu0 %v747_v8 }
  0x46   :  { %704 = vmatpush3.bf16.msra.mxu0 %v747_v8 }
  0x47   :  { %705 = vmatprep.subr.bf16.mxu0 %v749_v9 }
  0x4a   :  { %706 = vmatpush3.bf16.msra.mxu0 %v749_v9 }
  0x4b   :  { %707 = vmatprep.subr.bf16.mxu0 %v751_v11 }
  0x4e   :  { %708 = vmatpush3.bf16.msra.mxu0 %v751_v11 }
  0x4f   :  { %709 = vmatprep.subr.bf16.mxu0 %v753_v16 }
  0x52   :  { %710 = vmatpush3.bf16.msra.mxu0 %v753_v16 }
  0x55   :  { %712 = vmatmul.mubr.bf16.vlgmr.msra.gmra.mrb[0].mxu0 %v596_v19 }
 0x10a   :  { %v673_v20 = vpop.f32.mrb[0].mxu1 }
 0x10b   :  { %v213_v21 = vpop.f32.mrb[1].mxu1 }
 0x10c   :  { %v674_v22 = vpop.f32.mrb[2].mxu1 }
 0x10d   :  { %v216_v23 = vpop.f32.mrb[3].mxu1 }
 0x128   :  { %v713_v24 = vpop.f32.mrb[0].mxu0 }
 0x129   :  { %v715_v25 = vadd.f32 %v713_v24, %v673_v20  ;;  %v467_v27 = vpop.f32.mrb[1].mxu0 }
 0x12a   :  { %v716_v28 = vadd.f32 %v467_v27, %v213_v21  ;;  %v714_v29 = vpop.f32.mrb[2].mxu0 }
 0x12b   :  { %v717_v30 = vadd.f32 %v714_v29, %v674_v22  ;;  %v470_v31 = vpop.f32.mrb[3].mxu0  ;;  %v495_v34 = vadd.f32 %v715_v25, %v605_v26 }
 0x12c   :  { %v493_v32 = vadd.f32 %v716_v28, %v605_v26  ;;  %v718_v33 = vadd.f32 %v470_v31, %v216_v23 }
 0x12d   :  { %v496_v35 = vadd.f32 %v717_v30, %v605_v26  ;;  %v528_v42 = vmul.f32 %v495_v34, %v495_v34 }
 0x12e   :  { %v494_v36 = vadd.f32 %v718_v33, %v605_v26  ;;  %v526_v38 = vmul.f32 %v493_v32, %v493_v32 }
 0x12f   :  { %v622_v37 = vpack.c.bf16 %v496_v35, %v495_v34 }
 0x130   :  { %v517_v39 = vadd.f32 %v494_v36, %v493_v32  ;;  %v527_v40 = vmul.f32 %v494_v36, %v494_v36  ;;  %v617_v41 = vpack.c.bf16 %v494_v36, %v493_v32 }
 0x131   :  { %624 = vst [vmem:[#allocation5 + $0x8] sm:$0xff] %v622_v37  }
 0x132   :  { %v518_v43 = vadd.f32 %v517_v39, %v495_v34  ;;  %v530_v44 = vadd.f32 %v527_v40, %v526_v38  ;;  %618 = vst [vmem:[#allocation5] sm:$0xff] %v617_v41  }
 0x133   :  { %787 = shalt.err (!%p784_p12)
}
 0x134   :  { %s788_s23 = scalar_lea.hbm %s977_s3, 256 }
 0x135   :  { %p789_p13 = scmp.ne.s32.totalorder %s977_s3, %s788_s23  ;;  %p792_p0 = scmp.lt.u32.totalorder %s788_s23, %s977_s3 }
 0x137   :  { %p794_p1 = pnand %p792_p0, %p789_p13 }
 0x139   :  { %797 = shalt.err (!%p794_p1)
}
 0x13a   :  { %553 = dma.vmem_to_hbm [thread:$0]  %s548_s20, 256, %s977_s3, [#allocation4], %s827_s25, %s827_s25, %s828_s26   ;;  %v529_v45 = vmul.f32 %v496_v35, %v496_v35  ;;  %v519_v46 = vadd.f32 %v518_v43, %v496_v35  ;;  %v531_v47 = vadd.f32 %v530_v44, %v528_v42  ;;  %vm539_vm6 = vcmask 1040384  }
 0x13b   :  { %s830_s6 = smov [#allocation6]  }
 0x13c   :  { %v520_v48 = vrot.slane %v519_v46, 4  ;;  %v532_v49 = vadd.f32 %v531_v47, %v529_v45  ;;  %s560_s1 = sshll.u32 %s830_s6, 4  ;;  %s561_s1 = int_to_ptr.vmem [resolvable:$true] %s560_s1 }
 0x13d   :  { %s798_s3 = scalar_lea.vmem %s561_s1, 32  ;;  %p803_p3 = scmp.lt.s32.totalorder %s561_s1, %s561_s1 }
 0x13e   :  { %v521_v50 = vadd.f32 %v520_v48, %v519_v46  ;;  %v533_v51 = vrot.slane %v532_v49, 4  ;;  %p799_p2 = scmp.ne.s32.totalorder %s561_s1, %s798_s3  ;;  %p804_p4 = scmp.lt.s32.totalorder %s798_s3, %s798_s3 }
 0x140   :  { %v522_v52 = vrot.slane %v521_v50, 2  ;;  %v534_v53 = vadd.f32 %v533_v51, %v532_v49  ;;  %p805_p5 = por %p804_p4, %p803_p3 }
 0x142   :  { %v523_v54 = vadd.f32 %v522_v52, %v521_v50  ;;  %v535_v55 = vrot.slane %v534_v53, 2  ;;  %p806_p6 = pnand %p805_p5, %p799_p2 }
 0x144   :  { %v524_v56 = vrot.slane %v523_v54, 1  ;;  %v536_v57 = vadd.f32 %v535_v55, %v534_v53 }
 0x146   :  { %v537_v58 = vrot.slane %v536_v57, 1  ;;  %v525_v59 = vadd.f32 %v524_v56, %v523_v54 }
 0x148   :  { %v538_v60 = vadd.f32 %v537_v58, %v536_v57 }
 0x14a   :  { %v540_v61 = vsel %vm539_vm6, %v525_v59, %v538_v60 }
 0x14b   :  { %541 = vst [vmem:[#allocation6] sm:$0x3] %v540_v61 }
 0x14c   :  { %809 = shalt.err (!%p806_p6)
}
 0x14d   :  { %s810_s7 = scalar_lea.hbm %s978_s4, 32 }
 0x14e   :  { %p811_p7 = scmp.ne.s32.totalorder %s978_s4, %s810_s7  ;;  %p814_p8 = scmp.lt.u32.totalorder %s810_s7, %s978_s4 }
 0x150   :  { %p816_p9 = pnand %p814_p8, %p811_p7 }
 0x152   :  { %819 = shalt.err (!%p816_p9)
}
 0x153   :  { %563 = dma.vmem_to_hbm [thread:$0]  %s561_s1, 32, %s978_s4, [#allocation7]  }
 0x154   :  { %822 = dma.done.wait [#allocation4], 256  }
 0x155   :  { %823 = vsyncadd [#allocation4], 4294967040 }
 0x156   :  { %824 = dma.done.wait [#allocation7], 32  }
 0x157   :  { %825 = vsyncadd [#allocation7], 4294967264 }
 0x158   :  { %570 = vsyncpa [#allocation3], 1 }
 0x159   :  { %571 = vsyncpa [#allocation4], 1 }
 0x15a   :  { %572 = vsyncpa [#allocation7], 1 }

</bundles_post_ra>
